<compile_context>
chip_gen: v6e
topology: v6e:2x2x1
jax: 0.10.0
libtpu: 0.0.40
codegen_flags: <defaults>
</compile_context>

<pallas_src>
import jax
import jax.numpy as jnp
from jax import lax
from jax.experimental import pallas as pl
from jax.experimental.pallas import tpu as pltpu


def _round_up(n, m):
    return (n + m - 1) // m * m


def _normed_head_kernel(x_ref, wn_ref, o_ref):
    """out = (x @ w_n) * (20 / max(||x||_2, 1e-12)) per row.

    w_n (column-normalized weights, bf16 by default) is precomputed outside the
    kernel.  Scaling rows AFTER the matmul is mathematically identical to
    normalizing x first and multiplying by 20, but only touches (TB, 128) lanes.
    Row-norm math stays f32; only the MXU operands are cast to the weight dtype.
    """
    x = x_ref[...]                                           # (TB, Dp) f32
    sumsq = jnp.sum(x * x, axis=1, keepdims=True)            # (TB, 1) f32
    # 20 / max(||x||, 1e-12) == 20 * rsqrt(max(||x||^2, 1e-24))   (EUP slot)
    scale = 20.0 * lax.rsqrt(jnp.maximum(sumsq, 1e-24))
    out = jnp.dot(x.astype(wn_ref.dtype), wn_ref[...],       # MXU matmul, f32 acc
                  preferred_element_type=jnp.float32)
    o_ref[...] = out * scale                                 # *20 folded into row scale


def prepare_weights(w_seen, w_unseen, matmul_dtype=jnp.bfloat16):
    """One-time setup (hoisted out of the per-call kernel).

    Column-normalize both heads, concat along columns, zero-pad to lane-dense
    multiples of 128.  Zero padding is numerically transparent.

    matmul_dtype:
      * jnp.bfloat16 (default) — native MXU operand on v5e, v6e and v7x; halves the
        dominant weight DMA and avoids multi-pass f32 MXU emulation.
      * jnp.float32 — exact-precision path matching the PyTorch f32 module to ~1e-5.
    """
    eps = 1e-12
    w = jnp.concatenate([w_seen, w_unseen], axis=1)               # (D, O1+O2)
    col_norm = jnp.sqrt(jnp.sum(w * w, axis=0, keepdims=True))
    w_n = w / jnp.maximum(col_norm, eps)
    D, O = w_n.shape
    Dp, Op = _round_up(D, 128), _round_up(O, 128)
    if (Dp, Op) != (D, O):
        w_n = jnp.pad(w_n, ((0, Dp - D), (0, Op - O)))
    return w_n.astype(matmul_dtype)


def mlp_double_forward(x, wn_packed, out_dim_1, out_dim_2):
    """Returns (cat(seen, unseen), seen, unseen) exactly like MLP_double.forward."""
    B, D = x.shape
    Dp, Op = wn_packed.shape
    assert Dp >= D and Op % 128 == 0

    wbytes = jnp.dtype(wn_packed.dtype).itemsize
    # bf16 operands pack 2 rows / sublane -> align batch to 16; f32 -> 8.
    row_align = 16 if wbytes < 4 else 8

    if B <= 1024:
        # Single grid step: whole (padded) problem resident in VMEM.
        TB = _round_up(max(B, row_align), row_align)
        Bp = TB
    else:
        # Batch-parallel grid: 512-row tiles (multiple of 8 and 16), weight block
        # resident across steps via constant index_map.
        TB = 512
        Bp = _round_up(B, TB)
    grid = (Bp // TB,)

    # Skip pad/astype entirely when nothing to do (common case: D=768=6*128, aligned B).
    xp = x if x.dtype == jnp.float32 else x.astype(jnp.float32)
    if Bp != B or Dp != D:
        xp = jnp.pad(xp, ((0, Bp - B), (0, Dp - D)))

    # VMEM budget from the actual footprint (x2 for double buffering) + headroom.
    vmem_bytes = 2 * (TB * Dp * 4 + Dp * Op * wbytes + TB * Op * 4) + (2 << 20)

    out = pl.pallas_call(
        _normed_head_kernel,
        out_shape=jax.ShapeDtypeStruct((Bp, Op), jnp.float32),
        grid=grid,
        in_specs=[
            pl.BlockSpec((TB, Dp), lambda i: (i, 0)),
            pl.BlockSpec((Dp, Op), lambda i: (0, 0)),   # weight block resident
        ],
        out_specs=pl.BlockSpec((TB, Op), lambda i: (i, 0)),
        compiler_params=pltpu.CompilerParams(
            dimension_semantics=("parallel",),
            vmem_limit_bytes=vmem_bytes,
        ),
    )(xp, wn_packed)

    # Slice directly from the kernel output (no slice-of-slice chains).
    n_out = out_dim_1 + out_dim_2
    out_cat = out[:B, :n_out]
    out_seen = out[:B, :out_dim_1]
    out_unseen = out[:B, out_dim_1:n_out]
    return out_cat, out_seen, out_unseen


def init_normed_linear_weight(key, in_features, out_features):
    """Replica of: weight.uniform_(-1, 1).renorm_(2, 1, 1e-05).mul_(100000.0)."""
    w = jax.random.uniform(key, (in_features, out_features),
                           dtype=jnp.float32, minval=-1.0, maxval=1.0)
    col_norm = jnp.sqrt(jnp.sum(w * w, axis=0, keepdims=True))
    scale = jnp.where(col_norm > 1e-5, 1e-5 / (col_norm + 1e-7), 1.0)
    return w * scale * 1e5


def reference_forward(x, w_seen, w_unseen):
    """Pure-JAX replica of the PyTorch MLP_double.forward (for sanity check)."""
    eps = 1e-12

    def head(xx, w):
        x_n = xx / jnp.maximum(jnp.linalg.norm(xx, axis=1, keepdims=True), eps)
        w_n = w / jnp.maximum(jnp.linalg.norm(w, axis=0, keepdims=True), eps)
        return (x_n @ w_n) * 20.0

    s = head(x, w_seen)
    u = head(x, w_unseen)
    return jnp.concatenate([s, u], axis=1), s, u


if __name__ == "__main__":
    in_dim, out_dim_1, out_dim_2 = 768, 35, 30   # MLP_double defaults
    batch = 8

    key = jax.random.PRNGKey(0)
    kx, k1, k2 = jax.random.split(key, 3)
    x = jax.random.normal(kx, (batch, in_dim), dtype=jnp.float32)
    w_seen = init_normed_linear_weight(k1, in_dim, out_dim_1)
    w_unseen = init_normed_linear_weight(k2, in_dim, out_dim_2)

    ref_cat, ref_seen, ref_unseen = reference_forward(x, w_seen, w_unseen)

    # --- default bf16 MXU-operand path (recommended on v5e/v6e/v7x) ---
    wn_bf16 = prepare_weights(w_seen, w_unseen)                 # bf16 default
    out_cat, out_seen, out_unseen = mlp_double_forward(x, wn_bf16, out_dim_1, out_dim_2)
    out_cat = jax.block_until_ready(out_cat)
    assert out_cat.shape == (batch, out_dim_1 + out_dim_2)
    assert out_seen.shape == (batch, out_dim_1)
    assert out_unseen.shape == (batch, out_dim_2)
    assert jnp.allclose(out_cat, ref_cat, atol=2e-1, rtol=5e-2)
    assert jnp.allclose(out_seen, ref_seen, atol=2e-1, rtol=5e-2)
    assert jnp.allclose(out_unseen, ref_unseen, atol=2e-1, rtol=5e-2)

    # --- f32 path (tight tolerance against the exact module semantics) ---
    wn_f32 = prepare_weights(w_seen, w_unseen, jnp.float32)
    f_cat, f_seen, f_unseen = mlp_double_forward(x, wn_f32, out_dim_1, out_dim_2)
    f_cat = jax.block_until_ready(f_cat)
    assert jnp.allclose(f_cat, ref_cat, atol=1e-4, rtol=1e-4)
    assert jnp.allclose(f_seen, ref_seen, atol=1e-4, rtol=1e-4)
    assert jnp.allclose(f_unseen, ref_unseen, atol=1e-4, rtol=1e-4)

    # --- larger batch: exercises the batch-parallel grid path ---
    big_b = 2048
    xb = jax.random.normal(jax.random.PRNGKey(1), (big_b, in_dim), dtype=jnp.float32)
    ref_big, _, _ = reference_forward(xb, w_seen, w_unseen)
    big_cat, _, _ = mlp_double_forward(xb, wn_bf16, out_dim_1, out_dim_2)
    big_cat = jax.block_until_ready(big_cat)
    assert big_cat.shape == (big_b, out_dim_1 + out_dim_2)
    assert jnp.allclose(big_cat, ref_big, atol=2e-1, rtol=5e-2)

    print("KERNEL_OK")
</pallas_src>

<mosaic_0001>
module attributes {stable_mosaic.version = 11 : i64} {
  func.func @_normed_head_kernel(%arg0: i32, %arg1: memref<16x768xf32, #tpu.memory_space<vmem>>, %arg2: memref<768x128xbf16, #tpu.memory_space<vmem>>, %arg3: memref<16x128xf32, #tpu.memory_space<vmem>>) attributes {dimension_semantics = [#tpu.dimension_semantics<parallel>], iteration_bounds = array<i64: 1>, scalar_prefetch = 0 : i64, scratch_operands = 0 : i64, tpu.core_type = #tpu.core_type<tc>, window_params = [{transform_indices = @transform_0, window_bounds = array<i64: 16, 768>}, {pipeline_mode = #tpu.pipeline_mode<synchronous>, transform_indices = @transform_1, window_bounds = array<i64: 768, 128>}, {transform_indices = @transform_2, window_bounds = array<i64: 16, 128>}]} {
    %c0 = arith.constant 0 : index
    %c0_0 = arith.constant 0 : index
    %0 = vector.load %arg1[%c0, %c0_0] : memref<16x768xf32, #tpu.memory_space<vmem>>, vector<16x768xf32>
    %1 = arith.mulf %0, %0 : vector<16x768xf32>
    %cst = arith.constant dense<0.000000e+00> : vector<16xf32>
    %2 = vector.multi_reduction <add>, %1, %cst [1] : vector<16x768xf32> to vector<16xf32>
    %3 = vector.shape_cast %2 : vector<16xf32> to vector<16x1xf32>
    %cst_1 = arith.constant 1.000000e-24 : f32
    %4 = vector.broadcast %cst_1 : f32 to vector<16x1xf32>
    %5 = arith.maximumf %3, %4 : vector<16x1xf32>
    %6 = math.rsqrt %5 : vector<16x1xf32>
    %cst_2 = arith.constant 2.000000e+01 : f32
    %7 = vector.broadcast %cst_2 : f32 to vector<16x1xf32>
    %8 = arith.mulf %7, %6 : vector<16x1xf32>
    %9 = arith.truncf %0 : vector<16x768xf32> to vector<16x768xbf16>
    %c0_3 = arith.constant 0 : index
    %c0_4 = arith.constant 0 : index
    %10 = vector.load %arg2[%c0_3, %c0_4] : memref<768x128xbf16, #tpu.memory_space<vmem>>, vector<768x128xbf16>
    %cst_5 = arith.constant dense<0.000000e+00> : vector<16x128xf32>
    %11 = tpu.matmul %9, %10, %cst_5 {dimension_numbers = #tpu.dot_dimension_numbers<[1], [0], [0], [1], [0, 0, 1, 1], [], []>} : vector<16x768xbf16>, vector<768x128xbf16>, vector<16x128xf32> -> vector<16x128xf32>
    %12 = vector.broadcast %8 : vector<16x1xf32> to vector<16x128xf32>
    %13 = arith.mulf %11, %12 : vector<16x128xf32>
    %c0_6 = arith.constant 0 : index
    %c0_7 = arith.constant 0 : index
    %14 = vector.load %arg3[%c0_6, %c0_7] : memref<16x128xf32, #tpu.memory_space<vmem>>, vector<16x128xf32>
    tpu.vector_store %arg3[%c0_6, %c0_7], %13 {strides = array<i32>} : memref<16x128xf32, #tpu.memory_space<vmem>>, vector<16x128xf32>,
    return
  }
  func.func @transform_0(%arg0: i32) -> (i32, i32) {
    %c0_i32 = arith.constant 0 : i32
    %c0_i32_0 = arith.constant 0 : i32
    return %arg0, %c0_i32 : i32, i32
  }
  func.func @transform_1(%arg0: i32) -> (i32, i32) {
    %c0_i32 = arith.constant 0 : i32
    %c0_i32_0 = arith.constant 0 : i32
    %c0_i32_1 = arith.constant 0 : i32
    return %c0_i32, %c0_i32_0 : i32, i32
  }
  func.func @transform_2(%arg0: i32) -> (i32, i32) {
    %c0_i32 = arith.constant 0 : i32
    %c0_i32_0 = arith.constant 0 : i32
    return %arg0, %c0_i32 : i32, i32
  }
}

</mosaic_0001>

<bundles_post_ra>
// kernel: tpu_custom_call.1
= control target key start
LH: loop header
LB: loop body
LE: loop exit
PB: predicated region body
PF: predicated region fallthrough
CT: control target
= control target key end

     0   :  { %7 = vsyncpa [#allocation3], 0  ;;  %s894_s0 = inlined_call_operand.hbm [shape: f32[16,768], index: 0, kind: input, shape index: {}]   ;;  %s895_s1 = inlined_call_operand.hbm [shape: bf16[768,128], index: 1, kind: input, shape index: {}]   ;;  %s896_s2 = inlined_call_operand.hbm [shape: f32[16,128], index: 2, kind: output, shape index: {}]  }
   0x1   :  { %8 = vsyncpa [#allocation6], 0 }
   0x2   :  { %9 = vsyncpa [#allocation4], 0  ;;  %s861_s9 = smov [#allocation2]  }
   0x3   :  { %s15_s10 = sshll.u32 %s861_s9, 4  ;;  %s16_s10 = int_to_ptr.vmem [resolvable:$true] %s15_s10 }
   0x4   :  { %s803_s11 = scalar_lea.vmem %s16_s10, 1536  ;;  %p808_p1 = scmp.lt.s32.totalorder %s16_s10, %s16_s10 }
   0x5   :  { %p804_p0 = scmp.ne.s32.totalorder %s16_s10, %s803_s11  ;;  %p809_p2 = scmp.lt.s32.totalorder %s803_s11, %s803_s11 }
   0x7   :  { %p810_p3 = por %p809_p2, %p808_p1 }
   0x9   :  { %p811_p4 = pnand %p810_p3, %p804_p0 }
   0xb   :  { %814 = shalt.err (!%p811_p4)
}
   0xc   :  { %s862_s12 = smov 768   ;;  %s863_s13 = smov 48  }
   0xd   :  { %21 = dma.hbm_to_vmem [thread:$0]  %s894_s0, 1536, %s16_s10, [#allocation3], %s862_s12, %s862_s12, %s863_s13  }
   0xe   :  { %s864_s16 = smov [#allocation5]  }
   0xf   :  { %s27_s17 = sshll.u32 %s864_s16, 4  ;;  %s28_s17 = int_to_ptr.vmem [resolvable:$true] %s27_s17 }
  0x10   :  { %s823_s18 = scalar_lea.vmem %s28_s17, 6144  ;;  %p828_p6 = scmp.lt.s32.totalorder %s28_s17, %s28_s17 }
  0x11   :  { %p824_p5 = scmp.ne.s32.totalorder %s28_s17, %s823_s18  ;;  %p829_p7 = scmp.lt.s32.totalorder %s823_s18, %s823_s18 }
  0x13   :  { %p830_p8 = por %p829_p7, %p828_p6 }
  0x15   :  { %p831_p9 = pnand %p830_p8, %p824_p5 }
  0x17   :  { %834 = shalt.err (!%p831_p9)
}
  0x18   :  { %s865_s19 = smov 64   ;;  %s866_s20 = smov 4  }
  0x19   :  { %33 = dma.hbm_to_vmem [thread:$0]  %s895_s1, 6144, %s28_s17, [#allocation6], %s865_s19, %s865_s19, %s866_s20  }
  0x1a   :  { %855 = dma.done.wait [#allocation3], 1536  }
  0x1b   :  { %856 = vsyncadd [#allocation3], 4294965760 }
  0x1c   :  { %857 = dma.done.wait [#allocation6], 6144  }
  0x1d   :  { %858 = vsyncadd [#allocation6], 4294961152  ;;  %v743_v0 = vld [vmem:[#allocation5 + $0x78] sm:$0xff]   ;;  %v747_v4 = vld [vmem:[#allocation5 + $0x70] sm:$0xff]   ;;  %s867_s0 = smov [#allocation7]  }
  0x1e   :  { %v744_v1 = vld [vmem:[#allocation5 + $0xf8] sm:$0xff]   ;;  %668 = vmatprep.subr.bf16.mxu0 %v743_v0  ;;  %v748_v5 = vld [vmem:[#allocation5 + $0xf0] sm:$0xff]   ;;  %v751_v8 = vld [vmem:[#allocation5 + $0x68] sm:$0xff]   ;;  %s607_s1 = sshll.u32 %s867_s0, 4  ;;  %s608_s1 = int_to_ptr.vmem [resolvable:$true] %s607_s1 }
  0x1f   :  { %v745_v2 = vld [vmem:[#allocation5 + $0x38] sm:$0xff]   ;;  %690 = vmatprep.subr.bf16.mxu1 %v744_v1  ;;  %v749_v6 = vld [vmem:[#allocation5 + $0x30] sm:$0xff]   ;;  %v752_v9 = vld [vmem:[#allocation5 + $0xe8] sm:$0xff]   ;;  %s835_s23 = scalar_lea.vmem %s608_s1, 256  ;;  %p840_p11 = scmp.lt.s32.totalorder %s608_s1, %s608_s1 }
  0x20   :  { %v746_v3 = vld [vmem:[#allocation5 + $0xb8] sm:$0xff]   ;;  %669 = vmatpush3.bf16.msra.mxu0 %v745_v2  ;;  %v750_v7 = vld [vmem:[#allocation5 + $0xb0] sm:$0xff]   ;;  %v753_v10 = vld [vmem:[#allocation5 + $0x28] sm:$0xff]   ;;  %p836_p10 = scmp.ne.s32.totalorder %s608_s1, %s835_s23  ;;  %p841_p12 = scmp.lt.s32.totalorder %s835_s23, %s835_s23 }
  0x21   :  { %691 = vmatpush3.bf16.msra.mxu1 %v746_v3  ;;  %670 = vmatprep.subr.bf16.mxu0 %v747_v4  ;;  %v754_v11 = vld [vmem:[#allocation5 + $0xa8] sm:$0xff]   ;;  %v755_v12 = vld [vmem:[#allocation5 + $0x60] sm:$0xff]   ;;  %v759_v16 = vld [vmem:[#allocation5 + $0x58] sm:$0xff]  }
  0x22   :  { %692 = vmatprep.subr.bf16.mxu1 %v748_v5  ;;  %v756_v13 = vld [vmem:[#allocation5 + $0xe0] sm:$0xff]   ;;  %v760_v17 = vld [vmem:[#allocation5 + $0xd8] sm:$0xff]   ;;  %v763_v20 = vld [vmem:[#allocation5 + $0x50] sm:$0xff]   ;;  %p842_p13 = por %p841_p12, %p840_p11 }
  0x23   :  { %v757_v14 = vld [vmem:[#allocation5 + $0x20] sm:$0xff]   ;;  %v761_v18 = vld [vmem:[#allocation5 + $0x18] sm:$0xff]   ;;  %v764_v21 = vld [vmem:[#allocation5 + $0xd0] sm:$0xff]  }
  0x24   :  { %671 = vmatpush3.bf16.msra.mxu0 %v749_v6  ;;  %v758_v15 = vld [vmem:[#allocation5 + $0xa0] sm:$0xff]   ;;  %v762_v19 = vld [vmem:[#allocation5 + $0x98] sm:$0xff]   ;;  %v765_v22 = vld [vmem:[#allocation5 + $0x10] sm:$0xff]   ;;  %p843_p0 = pnand %p842_p13, %p836_p10 }
  0x25   :  { %693 = vmatpush3.bf16.msra.mxu1 %v750_v7  ;;  %672 = vmatprep.subr.bf16.mxu0 %v751_v8  ;;  %v766_v23 = vld [vmem:[#allocation5 + $0x90] sm:$0xff]   ;;  %v767_v24 = vld [vmem:[#allocation5 + $0x48] sm:$0xff]   ;;  %v771_v28 = vld [vmem:[#allocation5 + $0x40] sm:$0xff]  }
  0x26   :  { %694 = vmatprep.subr.bf16.mxu1 %v752_v9  ;;  %v768_v25 = vld [vmem:[#allocation5 + $0xc8] sm:$0xff]   ;;  %v772_v29 = vld [vmem:[#allocation5 + $0xc0] sm:$0xff]   ;;  %v47_v34 = vld [vmem:[#allocation2 + $0x30] sm:$0xff] }
  0x27   :  { %v769_v26 = vld [vmem:[#allocation5 + $0x8] sm:$0xff]   ;;  %v773_v30 = vld [vmem:[#allocation5] sm:$0xff]   ;;  %v48_v35 = vld [vmem:[#allocation2 + $0x38] sm:$0xff]  ;;  %v59_v49 = vmul.f32 %v47_v34, %v47_v34 }
  0x28   :  { %673 = vmatpush3.bf16.msra.mxu0 %v753_v10  ;;  %v770_v27 = vld [vmem:[#allocation5 + $0x88] sm:$0xff]   ;;  %v774_v31 = vld [vmem:[#allocation5 + $0x80] sm:$0xff]   ;;  %v44_v36 = vld [vmem:[#allocation2 + $0x18] sm:$0xff]  ;;  %v60_v50 = vmul.f32 %v48_v35, %v48_v35 }
  0x29   :  { %695 = vmatpush3.bf16.msra.mxu1 %v754_v11  ;;  %674 = vmatprep.subr.bf16.mxu0 %v755_v12  ;;  %v41_v32 = vld [vmem:[#allocation2] sm:$0xff]  ;;  %v42_v33 = vld [vmem:[#allocation2 + $0x8] sm:$0xff]  ;;  %v43_v41 = vld [vmem:[#allocation2 + $0x10] sm:$0xff]  ;;  %v56_v59 = vmul.f32 %v44_v36, %v44_v36 }
  0x2a   :  { %696 = vmatprep.subr.bf16.mxu1 %v756_v13  ;;  %v49_v37 = vld [vmem:[#allocation2 + $0x40] sm:$0xff]  ;;  %v85_v38 = vpack.c.bf16 %v47_v34, %v41_v32  ;;  %v86_v39 = vpack.c.bf16 %v48_v35, %v42_v33  ;;  %v50_v40 = vld [vmem:[#allocation2 + $0x48] sm:$0xff]  ;;  %v775_v43 = vld [vmem:[#allocation5 + $0x178] sm:$0xff]   ;;  %v53_v46 = vmul.f32 %v41_v32, %v41_v32  ;;  %v54_v48 = vmul.f32 %v42_v33, %v42_v33 }
  0x2b   :  { %v88_v42 = vpack.c.bf16 %v50_v40, %v44_v36  ;;  %v87_v44 = vpack.c.bf16 %v49_v37, %v43_v41  ;;  %v776_v45 = vld [vmem:[#allocation5 + $0x138] sm:$0xff]   ;;  %v777_v47 = vld [vmem:[#allocation5 + $0x170] sm:$0xff]   ;;  %v779_v52 = vld [vmem:[#allocation5 + $0x168] sm:$0xff]   ;;  %v72_v54 = vadd.f32 %v60_v50, %v59_v49  ;;  %v61_v55 = vmul.f32 %v49_v37, %v49_v37 }
  0x2c   :  { %675 = vmatpush3.bf16.msra.mxu0 %v757_v14  ;;  %507 = vmatprep.mubr.bf16.mxu0 %v86_v39  ;;  %v778_v51 = vld [vmem:[#allocation5 + $0x130] sm:$0xff]   ;;  %v65_v53 = vadd.f32 %v54_v48, %v53_v46  ;;  %v55_v56 = vmul.f32 %v43_v41, %v43_v41  ;;  %v780_v57 = vld [vmem:[#allocation5 + $0x128] sm:$0xff]   ;;  %v781_v58 = vld [vmem:[#allocation5 + $0x160] sm:$0xff]   ;;  %v62_v60 = vmul.f32 %v50_v40, %v50_v40 }
  0x2d   :  { %697 = vmatpush3.bf16.msra.mxu1 %v758_v15  ;;  %676 = vmatprep.subr.bf16.mxu0 %v759_v16  ;;  %v73_v61 = vadd.f32 %v72_v54, %v61_v55  ;;  %v782_v63 = vld [vmem:[#allocation5 + $0x120] sm:$0xff]   ;;  %v783_v0 = vld [vmem:[#allocation5 + $0x158] sm:$0xff]   ;;  %v46_v3 = vld [vmem:[#allocation2 + $0x28] sm:$0xff] }
  0x2e   :  { %698 = vmatprep.subr.bf16.mxu1 %v760_v17  ;;  %548 = vmatprep.mubr.bf16.mxu1 %v88_v42  ;;  %v66_v62 = vadd.f32 %v65_v53, %v55_v56  ;;  %v784_v2 = vld [vmem:[#allocation5 + $0x118] sm:$0xff]   ;;  %v45_v6 = vld [vmem:[#allocation2 + $0x20] sm:$0xff]  ;;  %v51_v7 = vld [vmem:[#allocation2 + $0x50] sm:$0xff]  ;;  %v58_v11 = vmul.f32 %v46_v3, %v46_v3 }
  0x2f   :  { %v74_v1 = vadd.f32 %v73_v61, %v62_v60  ;;  %v52_v5 = vld [vmem:[#allocation2 + $0x58] sm:$0xff]  ;;  %v785_v8 = vld [vmem:[#allocation5 + $0x150] sm:$0xff]   ;;  %v57_v10 = vmul.f32 %v45_v6, %v45_v6  ;;  %v63_v12 = vmul.f32 %v51_v7, %v51_v7  ;;  %v787_v17 = vld [vmem:[#allocation5 + $0x148] sm:$0xff]  }
  0x30   :  { %677 = vmatpush3.bf16.msra.mxu0 %v761_v18  ;;  %v67_v4 = vadd.f32 %v66_v62, %v56_v59  ;;  %v90_v9 = vpack.c.bf16 %v52_v5, %v46_v3  ;;  %v64_v14 = vmul.f32 %v52_v5, %v52_v5  ;;  %v786_v16 = vld [vmem:[#allocation5 + $0x110] sm:$0xff]  }
  0x31   :  { %699 = vmatpush3.bf16.msra.mxu1 %v762_v19  ;;  %678 = vmatprep.subr.bf16.mxu0 %v763_v20  ;;  %v75_v15 = vadd.f32 %v74_v1, %v63_v12  ;;  %v788_v20 = vld [vmem:[#allocation5 + $0x108] sm:$0xff]  }
  0x32   :  { %700 = vmatprep.subr.bf16.mxu1 %v764_v21  ;;  %v68_v13 = vadd.f32 %v67_v4, %v57_v10  ;;  %v789_v21 = vld [vmem:[#allocation5 + $0x140] sm:$0xff]  }
  0x33   :  { %v76_v19 = vadd.f32 %v75_v15, %v64_v14 }
  0x34   :  { %679 = vmatpush3.bf16.msra.mxu0 %v765_v22  ;;  %v69_v18 = vadd.f32 %v68_v13, %v58_v11  ;;  %v790_v22 = vld [vmem:[#allocation5 + $0x100] sm:$0xff]  }
  0x35   :  { %701 = vmatpush3.bf16.msra.mxu1 %v766_v23  ;;  %680 = vmatprep.subr.bf16.mxu0 %v767_v24  ;;  %v89_v23 = vpack.c.bf16 %v51_v7, %v45_v6 }
  0x36   :  { %702 = vmatprep.subr.bf16.mxu1 %v768_v25  ;;  %70 = vadd.xlane.f32.xlu0 %v69_v18 }
  0x38   :  { %681 = vmatpush3.bf16.msra.mxu0 %v769_v26 }
  0x39   :  { %703 = vmatpush3.bf16.msra.mxu1 %v770_v27  ;;  %682 = vmatprep.subr.bf16.mxu0 %v771_v28 }
  0x3a   :  { %704 = vmatprep.subr.bf16.mxu1 %v772_v29  ;;  %77 = vadd.xlane.f32.xlu0 %v76_v19 }
  0x3c   :  { %683 = vmatpush3.bf16.msra.mxu0 %v773_v30 }
  0x3d   :  { %705 = vmatpush3.bf16.msra.mxu1 %v774_v31  ;;  %712 = vmatprep.subr.bf16.mxu0 %v775_v43 }
  0x3f   :  { %508 = vmatmul.mubr.bf16.vlgmr.msra.gmra.mxu0 %v85_v38 }
  0x40   :  { %549 = vmatmul.mubr.bf16.vlgmr.msra.gmra.mxu1 %v87_v44  ;;  %713 = vmatpush3.bf16.msra.mxu0 %v776_v45 }
  0x41   :  { %714 = vmatprep.subr.bf16.mxu0 %v777_v47  ;;  %589 = vmatprep.mubr.bf16.mxu0 %v90_v9 }
  0x44   :  { %715 = vmatpush3.bf16.msra.mxu0 %v778_v51 }
  0x45   :  { %716 = vmatprep.subr.bf16.mxu0 %v779_v52 }
  0x48   :  { %717 = vmatpush3.bf16.msra.mxu0 %v780_v57 }
  0x49   :  { %718 = vmatprep.subr.bf16.mxu0 %v781_v58 }
  0x4c   :  { %719 = vmatpush3.bf16.msra.mxu0 %v782_v63 }
  0x4d   :  { %720 = vmatprep.subr.bf16.mxu0 %v783_v0 }
  0x50   :  { %721 = vmatpush3.bf16.msra.mxu0 %v784_v2 }
  0x51   :  { %722 = vmatprep.subr.bf16.mxu0 %v785_v8 }
  0x54   :  { %723 = vmatpush3.bf16.msra.mxu0 %v786_v16 }
  0x55   :  { %724 = vmatprep.subr.bf16.mxu0 %v787_v17 }
  0x58   :  { %725 = vmatpush3.bf16.msra.mxu0 %v788_v20 }
  0x59   :  { %726 = vmatprep.subr.bf16.mxu0 %v789_v21 }
  0x5c   :  { %727 = vmatpush3.bf16.msra.mxu0 %v790_v22 }
  0x5f   :  { %590 = vmatmul.mubr.bf16.vlgmr.msra.gmra.mxu0 %v89_v23 }
  0xbf   :  { %v71_v24 = vpop.xlane.xlu0 %70 }
  0xc0   :  { %v79_v25 = vmax.f32 %v71_v24, 1e-24 }
  0xc2   :  { %791 = vrsqrt.f32 %v79_v25 }
  0xc3   :  { %v78_v26 = vpop.xlane.xlu0 %77 }
  0xc4   :  { %v80_v28 = vmax.f32 %v78_v26, 1e-24 }
  0xc6   :  { %793 = vrsqrt.f32 %v80_v28 }
  0xcf   :  { %v792_v35 = vpop.eup %791 }
  0xd0   :  { %v83_v40 = vmul.f32 20.0, %v792_v35 }
  0xd3   :  { %v794_v46 = vpop.eup %793 }
  0xd4   :  { %v84_v51 = vmul.f32 20.0, %v794_v46 }
  0xff   :  { %v684_v27 = vpop.f32.mrf.mxu0 }
 0x100   :  { %v706_v29 = vpop.f32.mrf.mxu1 }
 0x101   :  { %v685_v30 = vpop.f32.mrf.mxu0 }
 0x102   :  { %v707_v31 = vpop.f32.mrf.mxu1  ;;  %v686_v36 = vadd.f32 %v685_v30, %v684_v27 }
 0x103   :  { %v687_v32 = vpop.f32.mrf.mxu0  ;;  %v708_v37 = vadd.f32 %v707_v31, %v706_v29 }
 0x104   :  { %v709_v33 = vpop.f32.mrf.mxu1 }
 0x105   :  { %v688_v34 = vpop.f32.mrf.mxu0  ;;  %v551_v42 = vadd.f32 %v708_v37, %v686_v36 }
 0x106   :  { %v710_v38 = vpop.f32.mrf.mxu1  ;;  %v689_v43 = vadd.f32 %v688_v34, %v687_v32 }
 0x107   :  { %v711_v44 = vadd.f32 %v710_v38, %v709_v33 }
 0x109   :  { %v554_v50 = vadd.f32 %v711_v44, %v689_v43 }
 0x11f   :  { %v728_v39 = vpop.f32.mrf.mxu0 }
 0x121   :  { %v729_v41 = vpop.f32.mrf.mxu0 }
 0x122   :  { %v730_v45 = vadd.f32 %v729_v41, %v728_v39 }
 0x123   :  { %v731_v47 = vpop.f32.mrf.mxu0 }
 0x124   :  { %v592_v48 = vadd.f32 %v730_v45, %v551_v42 }
 0x125   :  { %v732_v49 = vpop.f32.mrf.mxu0 }
 0x126   :  { %v598_v52 = vmul.f32 %v592_v48, %v83_v40  ;;  %v733_v53 = vadd.f32 %v732_v49, %v731_v47 }
 0x128   :  { %600 = vst [vmem:[#allocation7] sm:$0xff] %v598_v52  ;;  %v595_v54 = vadd.f32 %v733_v53, %v554_v50 }
 0x12a   :  { %v599_v55 = vmul.f32 %v595_v54, %v84_v51 }
 0x12c   :  { %601 = vst [vmem:[#allocation7 + $0x8] sm:$0xff] %v599_v55 }
 0x12d   :  { %846 = shalt.err (!%p843_p0)
}
 0x12e   :  { %s868_s24 = smov 128   ;;  %s869_s25 = smov 8  }
 0x12f   :  { %613 = dma.vmem_to_hbm [thread:$0]  %s608_s1, 256, %s896_s2, [#allocation4], %s868_s24, %s868_s24, %s869_s25  }
 0x130   :  { %859 = dma.done.wait [#allocation4], 256  }
 0x131   :  { %860 = vsyncadd [#allocation4], 4294967040 }
 0x132   :  { %617 = vsyncpa [#allocation3], 1 }
 0x133   :  { %618 = vsyncpa [#allocation6], 1 }
 0x134   :  { %619 = vsyncpa [#allocation4], 1 }

</bundles_post_ra>
